<compile_context>
chip_gen: v7x
topology: tpu7x:2x2x1
jax: 0.10.0
libtpu: 0.0.40
codegen_flags: <defaults>
</compile_context>

<pallas_src>
import jax
import jax.numpy as jnp
from jax.experimental import pallas as pl
from jax.experimental.pallas import tpu as pltpu


def _fusion_kernel(wl_ref, gb_ref, l_ref, o_ref):
    # wl_ref: (Cout, Cl)       1x1-conv weights on local channels (resident, tiled by pipeline)
    # gb_ref: (N, Cout, 1)     precomputed g @ W_g + bias, fully resident in VMEM
    # l_ref : (1, Cl, THW)     local-feature tile (channels x flattened spatial)
    # o_ref : (1, Cout, THW)   output tile
    b = pl.program_id(0)
    y = jnp.dot(wl_ref[...], l_ref[0], preferred_element_type=jnp.float32)   # (Cout, THW), f32 acc
    y = y + gb_ref[b]                                                        # (Cout, 1) broadcast over lanes
    o_ref[0] = jnp.maximum(y, 0.2 * y).astype(o_ref.dtype)                   # LeakyReLU(0.2)


def fusion_layer(l_nchw, g_nchw, w_conv, b_conv, inner_size, *,
                 use_bf16=True, out_dtype=None):
    """FusionLayer forward.

    l_nchw: (N, C_l, H, W) local features; g_nchw: (N, C_g, 1, 1) global features.
    w_conv: (fan_out, fan_in, 1, 1) PyTorch Conv2d weight; b_conv: (fan_out,).
    use_bf16: read l / W_l as bfloat16 (halves the dominant HBM read stream on
      all generations); accumulation and activation stay in f32.
    out_dtype: output store dtype (default: dtype of l_nchw).
    """
    N, C_l, H, W = l_nchw.shape
    _, C_g, _, _ = g_nchw.shape
    fan_out = w_conv.shape[0]
    assert H == inner_size and W == inner_size
    HW = H * W
    out_dtype = jnp.dtype(l_nchw.dtype if out_dtype is None else out_dtype)

    # Split the 1x1-conv weight along the concat boundary (local channels first,
    # then global channels — matches torch.cat([l, g.repeat(...)], dim=1)).
    w2d = w_conv.reshape(fan_out, C_l + C_g)        # (Cout, Cin)
    w_l = w2d[:, :C_l]                              # (Cout, Cl)
    w_g = w2d[:, C_l:]                              # (Cout, Cg)

    # Spatially-constant global + bias term, per batch element (f32).
    g_vec = g_nchw.reshape(N, C_g).astype(jnp.float32)
    gb = (g_vec @ jnp.transpose(w_g).astype(jnp.float32)
          + b_conv.astype(jnp.float32)[None, :]).reshape(N, fan_out, 1)

    # NCHW-native flatten: free reshape, no transpose.
    l_flat = l_nchw.reshape(N, C_l, HW)

    compute_dtype = jnp.bfloat16 if use_bf16 else l_nchw.dtype
    if use_bf16:
        l_flat = l_flat.astype(compute_dtype)
        w_l = w_l.astype(compute_dtype)

    # --- generation-aware VMEM budget & spatial (HW) tile selection -----------
    LANE = 128
    in_isz = jnp.dtype(compute_dtype).itemsize
    out_isz = out_dtype.itemsize

    try:
        vmem_cap = int(pltpu.get_tpu_info().vmem_capacity_bytes)
    except Exception:
        vmem_cap = 64 * 1024 * 1024                 # conservative (v7x per-TC) fallback
    # ~41 MiB on v7x (64 MiB physical), ~83 MiB on v5e/v6e (128 MiB physical).
    vmem_cap_limit = int(vmem_cap * 0.65)

    w_bytes = fan_out * C_l * in_isz                # weights (double-buffered by the pipeline)
    gb_bytes = N * fan_out * 4                      # resident gb
    fixed_bytes = 2 * w_bytes + gb_bytes + 4 * 1024 * 1024   # + Mosaic internal scratch margin
    tile_budget = max(vmem_cap_limit - fixed_bytes, 4 * 1024 * 1024)
    per_col = 2 * (C_l * in_isz + fan_out * out_isz)          # double-buffered l + out, per HW column
    max_thw = max(LANE, (tile_budget // max(per_col, 1)) // LANE * LANE)

    if HW <= LANE:
        # Tiny spatial extent: single full-width (sub-128, masked) tile.
        thw = HW
    else:
        hw_floor = (HW // LANE) * LANE
        thw = min(hw_floor, 8192, max_thw)
        thw = max(LANE, (thw // LANE) * LANE)
        # v7x: guarantee >= 2 grid tiles when batch alone can't feed both TensorCores.
        if N == 1 and thw >= HW and hw_floor >= 2 * LANE:
            thw = max(LANE, ((hw_floor // 2) // LANE) * LANE)
    n_hw = pl.cdiv(HW, thw)                         # partial last tile is masked by Pallas

    vmem_need = (2 * thw * (C_l * in_isz + fan_out * out_isz)   # double-buffered l + out tiles
                 + 2 * w_bytes + gb_bytes
                 + 2 * 1024 * 1024)                              # margin
    vmem_limit = int(min(max(vmem_need, 32 * 1024 * 1024), vmem_cap_limit))

    out_flat = pl.pallas_call(
        _fusion_kernel,
        out_shape=jax.ShapeDtypeStruct((N, fan_out, HW), out_dtype),
        grid_spec=pltpu.PrefetchScalarGridSpec(
            num_scalar_prefetch=0,
            grid=(N, n_hw),
            in_specs=[
                pl.BlockSpec((fan_out, C_l), lambda b, s: (0, 0)),          # weights (constant block)
                pl.BlockSpec(memory_space=pltpu.MemorySpace.VMEM),          # gb fully resident
                pl.BlockSpec((1, C_l, thw), lambda b, s: (b, 0, s)),        # local tile
            ],
            out_specs=pl.BlockSpec((1, fan_out, thw), lambda b, s: (b, 0, s)),
        ),
        compiler_params=pltpu.CompilerParams(
            dimension_semantics=("parallel", "parallel"),
            vmem_limit_bytes=vmem_limit,
        ),
    )(w_l, gb, l_flat)

    # Free reshape back to NCHW.
    return out_flat.reshape(N, fan_out, H, W)


def _reference(l_nchw, g_nchw, w_conv, b_conv, inner_size):
    # Pure-JAX reference of the PyTorch forward: cat -> 1x1 conv -> LeakyReLU(0.2).
    g_rep = jnp.tile(g_nchw, (1, 1, inner_size, inner_size))
    x = jnp.concatenate([l_nchw, g_rep], axis=1)              # (N, Cin, H, W)
    w2d = w_conv.reshape(w_conv.shape[0], -1)                  # (Cout, Cin)
    y = jnp.einsum('nchw,oc->nohw', x, w2d) + b_conv[None, :, None, None]
    return jnp.where(y > 0, y, 0.2 * y)


if __name__ == "__main__":
    def run_case(key, N, C_l, C_g, inner_size, fan_out, *, use_bf16, out_dtype, atol, rtol):
        k1, k2, k3, k4 = jax.random.split(key, 4)
        fan_in = C_l + C_g
        l = jax.random.normal(k1, (N, C_l, inner_size, inner_size), jnp.float32)
        g = jax.random.normal(k2, (N, C_g, 1, 1), jnp.float32)
        bound = 1.0 / (fan_in ** 0.5)
        w_conv = jax.random.uniform(k3, (fan_out, fan_in, 1, 1), jnp.float32, -bound, bound)
        b_conv = jax.random.uniform(k4, (fan_out,), jnp.float32, -bound, bound)

        out = fusion_layer(l, g, w_conv, b_conv, inner_size,
                           use_bf16=use_bf16, out_dtype=out_dtype)
        out = jax.block_until_ready(out)
        ref = _reference(l, g, w_conv, b_conv, inner_size)
        assert out.shape == (N, fan_out, inner_size, inner_size)
        assert jnp.allclose(out.astype(jnp.float32), ref, atol=atol, rtol=rtol), (
            f"mismatch: max abs err = {float(jnp.max(jnp.abs(out.astype(jnp.float32) - ref)))}")

    key = jax.random.PRNGKey(0)
    k0, k1, k2 = jax.random.split(key, 3)

    # (a) f32 path, tiny (sub-128, lane-masked) spatial extent — tight tolerance.
    run_case(k0, 2, 4, 4, 8, 8, use_bf16=False, out_dtype=None, atol=1e-4, rtol=1e-4)
    # (b) default path: bf16 reads + bf16 stores — loose tolerance (numerics knob, not a bug).
    run_case(k1, 2, 4, 4, 8, 8, use_bf16=True, out_dtype=jnp.bfloat16, atol=5e-2, rtol=5e-2)
    # (c) multi-tile grid with a masked partial tail tile (HW=576 -> thw=512, 2 spatial tiles).
    run_case(k2, 2, 8, 4, 24, 8, use_bf16=False, out_dtype=None, atol=1e-4, rtol=1e-4)

    print("KERNEL_OK")
</pallas_src>

<mosaic_0001>
module attributes {stable_mosaic.version = 11 : i64} {
  func.func @_fusion_kernel(%arg0: i32, %arg1: i32, %arg2: memref<8x4xf32, #tpu.memory_space<vmem>>, %arg3: memref<2x8x1xf32, #tpu.memory_space<vmem>>, %arg4: memref<1x4x64xf32, #tpu.memory_space<vmem>>, %arg5: memref<1x8x64xf32, #tpu.memory_space<vmem>>) attributes {dimension_semantics = [#tpu.dimension_semantics<parallel>, #tpu.dimension_semantics<parallel>], iteration_bounds = array<i64: 2, 1>, scalar_prefetch = 0 : i64, scratch_operands = 0 : i64, tpu.core_type = #tpu.core_type<tc>, window_params = [{pipeline_mode = #tpu.pipeline_mode<synchronous>, transform_indices = @transform_0, window_bounds = array<i64: 8, 4>}, {pipeline_mode = #tpu.pipeline_mode<synchronous>, transform_indices = @transform_1, window_bounds = array<i64: 2, 8, 1>}, {transform_indices = @transform_2, window_bounds = array<i64: 1, 4, 64>}, {transform_indices = @transform_3, window_bounds = array<i64: 1, 8, 64>}]} {
    %c0 = arith.constant 0 : index
    %c0_0 = arith.constant 0 : index
    %0 = vector.load %arg2[%c0, %c0_0] : memref<8x4xf32, #tpu.memory_space<vmem>>, vector<8x4xf32>
    %c0_1 = arith.constant 0 : index
    %c0_2 = arith.constant 0 : index
    %c0_3 = arith.constant 0 : index
    %1 = vector.load %arg4[%c0_1, %c0_2, %c0_3] : memref<1x4x64xf32, #tpu.memory_space<vmem>>, vector<1x4x64xf32>
    %2 = vector.shape_cast %1 : vector<1x4x64xf32> to vector<4x64xf32>
    %cst = arith.constant dense<0.000000e+00> : vector<8x64xf32>
    %3 = tpu.matmul %0, %2, %cst {dimension_numbers = #tpu.dot_dimension_numbers<[1], [0], [0], [1], [0, 0, 1, 1], [], []>} : vector<8x4xf32>, vector<4x64xf32>, vector<8x64xf32> -> vector<8x64xf32>
    %4 = arith.index_cast %arg0 : i32 to index
    %c0_4 = arith.constant 0 : index
    %c0_5 = arith.constant 0 : index
    %5 = vector.load %arg3[%4, %c0_4, %c0_5] : memref<2x8x1xf32, #tpu.memory_space<vmem>>, vector<1x8x1xf32>
    %6 = vector.shape_cast %5 : vector<1x8x1xf32> to vector<8x1xf32>
    %7 = vector.broadcast %6 : vector<8x1xf32> to vector<8x64xf32>
    %8 = arith.addf %3, %7 : vector<8x64xf32>
    %cst_6 = arith.constant 2.000000e-01 : f32
    %9 = vector.broadcast %cst_6 : f32 to vector<8x64xf32>
    %10 = arith.mulf %9, %8 : vector<8x64xf32>
    %11 = arith.maximumf %8, %10 : vector<8x64xf32>
    %c0_7 = arith.constant 0 : index
    %c0_8 = arith.constant 0 : index
    %c0_9 = arith.constant 0 : index
    %12 = vector.load %arg5[%c0_7, %c0_8, %c0_9] : memref<1x8x64xf32, #tpu.memory_space<vmem>>, vector<1x8x64xf32>
    %13 = vector.shape_cast %12 : vector<1x8x64xf32> to vector<8x64xf32>
    %14 = vector.shape_cast %11 : vector<8x64xf32> to vector<1x8x64xf32>
    tpu.vector_store %arg5[%c0_7, %c0_8, %c0_9], %14 {strides = array<i32>} : memref<1x8x64xf32, #tpu.memory_space<vmem>>, vector<1x8x64xf32>,
    return
  }
  func.func @transform_0(%arg0: i32, %arg1: i32) -> (i32, i32) {
    %c0_i32 = arith.constant 0 : i32
    %c0_i32_0 = arith.constant 0 : i32
    %c0_i32_1 = arith.constant 0 : i32
    return %c0_i32, %c0_i32_0 : i32, i32
  }
  func.func @transform_1(%arg0: i32, %arg1: i32) -> (i32, i32, i32) {
    %c0_i32 = arith.constant 0 : i32
    %c0_i32_0 = arith.constant 0 : i32
    %c0_i32_1 = arith.constant 0 : i32
    %c0_i32_2 = arith.constant 0 : i32
    return %c0_i32, %c0_i32_0, %c0_i32_1 : i32, i32, i32
  }
  func.func @transform_2(%arg0: i32, %arg1: i32) -> (i32, i32, i32) {
    %c0_i32 = arith.constant 0 : i32
    %c0_i32_0 = arith.constant 0 : i32
    return %arg0, %c0_i32, %arg1 : i32, i32, i32
  }
  func.func @transform_3(%arg0: i32, %arg1: i32) -> (i32, i32, i32) {
    %c0_i32 = arith.constant 0 : i32
    %c0_i32_0 = arith.constant 0 : i32
    return %arg0, %c0_i32, %arg1 : i32, i32, i32
  }
}

</mosaic_0001>

<bundles_post_ra>
// kernel: tpu_custom_call.1
= control target key start
LH: loop header
LB: loop body
LE: loop exit
PB: predicated region body
PF: predicated region fallthrough
CT: control target
= control target key end

     0   :  { %8 = vsyncpa [#allocation3], 0  ;;  %s674_s0 = inlined_call_operand.vmem [shape: f32[8,4], index: 0, kind: input, shape index: {}]   ;;  %s675_s1 = inlined_call_operand.vmem [shape: f32[2,8,1], index: 1, kind: input, shape index: {}]   ;;  %s676_s2 = inlined_call_operand.vmem [shape: f32[2,4,64], index: 2, kind: input, shape index: {}]   ;;  %s677_s3 = inlined_call_operand.hbm [shape: f32[2,8,64], index: 3, kind: output, shape index: {}]  }
   0x1   :  { %10 = vsyncpa [#allocation3 + $0x1], 0  ;;  %s555_s12 = smov 0   ;;  %s557_s13 = smov 0  }
   0x2   :  { %s559_s14 = smov 0   ;;  %s561_s15 = smov 0  }
   0x3   :  { %s563_s16 = smov 0   ;;  %s565_s17 = smov 0  }
   0x4 LB: > { %s371_s18 = sadd.s32 4294967295, %s529_s17   ;;  %s372_s19 = sadd.s32 4294967294, %s529_s17   ;;  %s529_s17 = sphi %s565_s17, %s16_s17   ;;  %s525_s16 = sphi %s563_s16, %s684_s16   ;;  %s521_s15 = sphi %s561_s15, %s683_s15   ;;  %s517_s14 = sphi %s559_s14, %s682_s14   ;;  %s513_s13 = sphi %s557_s13, %s681_s13   ;;  %s509_s12 = sphi %s555_s12, %s680_s12  }
   0x5   : > { %s28_s20 = sadd.s32 1, %s525_s16  ;;  %s107_s21 = sadd.s32 1, %s517_s14 }
   0x6   : > { %p30_p0 = scmp.ge.s32.totalorder %s28_s20, 2  ;;  %p117_p1 = scmp.ne.s32.totalorder %s517_s14, %s513_s13 }
   0x7   : > { %p118_p2 = scmp.eq.s32.totalorder %s371_s18, 1  ;;  %p123_p3 = scmp.ne.s32.totalorder %s513_s13, %s509_s12 }
   0x8   : > { %s686_s20 = smov (%p30_p0, %s28_s20), 0  ;;  %p124_p5 = scmp.eq.s32.totalorder %s372_s19, 1 }
   0x9   : > { %p595_p4 = por %p118_p2, %p117_p1  ;;  %s102_s23 = ssub.s32 %s525_s16, %s686_s20 }
   0xa   : > { %p375_p6 = scmp.ge.s32.totalorder %s529_s17, 1  ;;  %p105_p7 = scmp.eq.s32.totalorder %s102_s23, 0 }
   0xb   : > { %p602_p8 = por %p124_p5, %p123_p3  ;;  %p158_p9 = scmp.lt.s32.totalorder %s529_s17, 3 }
   0xc   : > { %s608_s25 = scalar_select %p105_p7, %s517_s14, %s107_s21  }
   0xd   : > { %p159_p10 = pnand %p375_p6, %p158_p9 }
   0xe   : > { %p184_p11 = scmp.lt.s32.totalorder (!%p159_p10), %s521_s15, 1  ;;  %v531_v0 = vmov (!%p159_p10), 0.0   ;;  %vm532_vm0 = vmmov (!%p159_p10), 0   ;;  %s378_s26 = sshll.u32 (!%p159_p10), %s521_s15, 3  ;;  %v533_v1 = vmov (!%p159_p10), 0   ;;  %vm205_vm1 = vcmask (!%p159_p10), 1043456  }
   0xf   : > { %162 = sbr.rel (%p159_p10) target bundleno = 260 (0x104), region = 32  ;;  %387 = vmatprep.subr.mxu0 (!%p159_p10), %v531_v0  ;;  %389 = vmatprep.mubr.msk.f32.mxu0 (!%p159_p10), %vm532_vm0, %v531_v0  ;;  %s194_s30 = scalar_lea.vmem (!%p159_p10), %s675_s1, %s378_s26  ;;  %v191_v3 = vld [vmem:[%s674_s0] sm:$0xff] (!%p159_p10)  ;;  %vm201_vm2 = vcmask (!%p159_p10), 31744   ;;  %vm281_vm3 = vcmask (!%p159_p10), 523264  }
  0x10   : > { %450 = vset.pattern.permute.xlu0 (!%p159_p10), %v533_v1  ;;  %v195_v2 = vld [vmem:[%s194_s30] sm:$0xff] (!%p159_p10)  ;;  %s181_s10 = sand.u32 (!%p159_p10), 1, %s513_s13   ;;  %s382_s18 = sshll.u32 (!%p159_p10), %s521_s15, 7 }
  0x11   : > { %198 = vperm.xlu0 (!%p159_p10), %450, %v195_v2   ;;  %s376_s11 = sshll.u32 (!%p159_p10), %s181_s10, 3  ;;  %s284_s28 = scalar_lea.sflag (!%p159_p10), [#allocation3], %s181_s10 }
  0x12   : > { %s183_s19 = scalar_lea.vmem (!%p159_p10), [#allocation2], %s376_s11 }
  0x13   : > { %s298_s21 = sshll.u32 (!%p159_p10), %s183_s19, 4  ;;  %s629_s21 = int_to_ptr.vmem [resolvable:$true] %s298_s21 }
  0x14   : > { %s451_s29 = scalar_lea.vmem (!%p159_p10), %s629_s21, 128 }
  0x15   : > { %p452_p12 = scmp.ne.s32.totalorder (!%p159_p10), %s629_s21, %s451_s29 }
  0x16   : > { %s185_s27 = scalar_select %p184_p11, %s521_s15, 1 }
  0x17   : > { %p453_p13 = pnand %p452_p12, %p595_p4  ;;  %s534_s15 = smov [#allocation2]  }
  0x18   : > { %s377_s4 = sshll.u32 %s185_s27, 2  ;;  %s627_s27 = scalar_lea.hbm %s677_s3, %s382_s18 }
  0x19   : > { %s190_s7 = scalar_lea.vmem %s676_s2, %s377_s4  ;;  %p454_p0 = pneg %p453_p13 }
  0x1a   : > { %v192_v4 = vld [vmem:[%s190_s7] sm:$0xf]  ;;  %s455_s30 = sshll.u32 %s534_s15, 4  ;;  %s456_s30 = int_to_ptr.vmem [resolvable:$false] %s455_s30 }
  0x1b   : > { %388 = vmatpush3.msk.msra.mxu0 %vm205_vm1, %v192_v4  ;;  %s457_s4 = scalar_lea.vmem %s456_s30, 256  ;;  %p458_p1 = scmp.lt.s32.totalorder %s629_s21, %s456_s30 }
  0x1c   : > { %390 = vmatmul.mubr.msk.f32.vlgmr.msra.gmra.mrb[0].mxu0 %vm201_vm2, %v191_v3  ;;  %p459_p2 = scmp.lt.s32.totalorder %s457_s4, %s451_s29 }
  0x1e   : > { %p460_p3 = por %p459_p2, %p458_p1 }
  0x20   : > { %p461_p5 = pnand %p460_p3, %p454_p0 }
  0x90   : > { %v199_v5 = vpop.permute.xlu0 %198 }
  0xef   : > { %v275_v6 = vpop.f32.mrb[0].mxu0 }
  0xf0   : > { %v276_v7 = vadd.f32 %v275_v6, %v199_v5  ;;  %v391_v8 = vpop.f32.mrb[1].mxu0 }
  0xf2   : > { %v279_v9 = vmul.f32 0.2, %v276_v7 }
  0xf4   : > { %v280_v10 = vmax.f32 %v276_v7, %v279_v9 }
  0xf6   : > { %282 = vst.msk [vmem:[%s183_s19] sm:$0xff] %vm281_vm3, %v280_v10 }
  0xf7   : > { %464 = shalt.err (!%p461_p5)
}
  0xf8   : > { %s465_s5 = scalar_lea.hbm %s627_s27, 128  ;;  %s469_s8 = scalar_lea.hbm %s677_s3, 256 }
  0xf9   : > { %p466_p6 = scmp.ne.s32.totalorder %s627_s27, %s465_s5  ;;  %p470_p10 = scmp.lt.u32.totalorder %s627_s27, %s677_s3 }
  0xfa   : > { %p471_p11 = scmp.lt.u32.totalorder %s469_s8, %s465_s5  ;;  %p473_p13 = scmp.lt.u32.totalorder %s465_s5, %s627_s27 }
  0xfb   : > { %p467_p7 = pnand %p466_p6, %p595_p4 }
  0xfc   : > { %p472_p12 = por %p471_p11, %p470_p10 }
  0xfd   : > { %p468_p9 = pneg %p467_p7 }
  0xfe   : > { %p474_p0 = por %p473_p13, %p472_p12 }
 0x100   : > { %p475_p1 = pnand %p474_p0, %p468_p9 }
 0x102   : > { %478 = shalt.err (!%p475_p1)
}
 0x103   : > { %392 = dma.vmem_to_hbm [thread:$0]  (%p595_p4), %s629_s21, 128, %s627_s27, %s284_s28  }
 0x104 PF: > { %p398_p2 = scmp.ge.s32.totalorder %s529_s17, 2  ;;  %s310_s11 = sand.u32 1, %s509_s12  }
 0x105   : > { %s311_s18 = scalar_lea.sflag [#allocation3], %s310_s11 }
 0x106   : > { %p395_p3 = pnand %p398_p2, %p602_p8 }
 0x108   : > { %504 = dma.done.wait (!%p395_p3), %s311_s18, 128  }
 0x109   : > { %506 = vsyncadd (!%p395_p3), %s311_s18, 4294967168  ;;  %s16_s17 = sadd.s32 1, %s529_s17   ;;  %s680_s12 = smov %s513_s13 }
 0x10a   : > { %p13_p5 = scmp.ge.s32.totalorder %s16_s17, 4   ;;  %s681_s13 = smov %s517_s14 }
 0x10b   : > { %s682_s14 = smov %s608_s25  ;;  %s683_s15 = smov %s525_s16 }
 0x10c   : > { %s684_s16 = smov %s686_s20  ;;  %15 = sbr.rel (!%p13_p5) target bundleno = 4 (0x4), region = 68 }
 0x113   :  { %316 = vsyncpa [#allocation3], 1 }
 0x114   :  { %318 = vsyncpa [#allocation3 + $0x1], 1 }

</bundles_post_ra>
